<compile_context>
chip_gen: v7x
topology: tpu7x:2x2x1
jax: 0.10.0
libtpu: 0.0.40
codegen_flags: <defaults>
</compile_context>

<pallas_src>
import jax
import jax.numpy as jnp
import numpy as np
from jax.experimental import pallas as pl
from jax.experimental.pallas import tpu as pltpu

HIDDEN_SIZE = 16
INPUT_SIZE = 3
OUTPUT_SIZE = 3
NUM_LAYERS = 1


def rnn_net_kernel(x_ref, h0_ref, wih_ref, whh_ref, b_ref, wlin_ref, blin_ref,
                   y_ref, hn_ref, hs_ref):
    """Single invocation: full RNN recurrence + hoisted output Linear.

    x_ref   : (B*T, I)   batch-first flattened input (contiguous, no transpose)
    h0_ref  : (B, H)     initial hidden state
    wih_ref : (I, H)     W_ih^T
    whh_ref : (H, H)     W_hh^T
    b_ref   : (1, H)     b_ih + b_hh
    wlin_ref: (H, O)     W_lin^T
    blin_ref: (1, O)     b_lin
    y_ref   : (B*T, O)   Linear output in PyTorch's flattened (batch-major) order
    hn_ref  : (B, H)     final hidden state
    hs_ref  : VMEM (B, T, H) scratch holding every h_t
    """
    B, T, H = hs_ref.shape

    # ---- input projection for all T steps at once (no recurrence dependency) ----
    z = jnp.dot(x_ref[...], wih_ref[...],
                preferred_element_type=jnp.float32) + b_ref[...]      # (B*T, H)
    z = z.reshape(B, T, H)                                            # free: split leading dim

    whh = whh_ref[...]                                                # (H, H)

    # ---- sequential recurrence, fully unrolled (T is small & static) ----
    h = h0_ref[...]                                                   # (B, H) f32, in vregs
    for t in range(T):
        h = jnp.tanh(z[:, t, :] +
                     jnp.dot(h, whh, preferred_element_type=jnp.float32))
        hs_ref[:, t:t + 1, :] = h[:, None, :]

    # ---- hoisted output Linear: one matmul over all B*T hidden states ----
    hs = hs_ref[...].reshape(B * T, H)                                # free: collapse leading dims
    y = jnp.dot(hs, wlin_ref[...],
                preferred_element_type=jnp.float32) + blin_ref[...]   # (B*T, O)
    y_ref[...] = y.astype(y_ref.dtype)
    hn_ref[...] = h.astype(hn_ref.dtype)


def _net_forward(x, hidden_prev, params):
    """x: (B, T, I) batch_first, hidden_prev: (1, B, H). Returns (out, hidden)."""
    B, T, I = x.shape
    H = params["w_hh"].shape[0]
    O = params["w_lin"].shape[0]

    x_flat = x.reshape(B * T, I)                        # contiguous reshape, no transpose
    h0 = hidden_prev[0].astype(jnp.float32)             # (B, H)
    wih_t = params["w_ih"].T                            # (I, H)
    whh_t = params["w_hh"].T                            # (H, H)
    b = (params["b_ih"] + params["b_hh"])[None, :]      # (1, H)
    wlin_t = params["w_lin"].T                          # (H, O)
    blin = params["b_lin"][None, :]                     # (1, O)

    vmem = pltpu.MemorySpace.VMEM
    y_flat, h_n = pl.pallas_call(
        rnn_net_kernel,
        out_shape=(
            jax.ShapeDtypeStruct((B * T, O), jnp.float32),
            jax.ShapeDtypeStruct((B, H), jnp.float32),
        ),
        # Single grid step -> every operand is a full-array VMEM input/output.
        in_specs=[pl.BlockSpec(memory_space=vmem)] * 7,
        out_specs=(
            pl.BlockSpec(memory_space=vmem),
            pl.BlockSpec(memory_space=vmem),
        ),
        scratch_shapes=[pltpu.VMEM((B, T, H), jnp.float32)],
    )(x_flat, h0, wih_t, whh_t, b, wlin_t, blin)

    # PyTorch: out.view(-1, H) @ W_lin^T + b_lin, then unsqueeze(0) -> (1, B*T, O).
    out = y_flat[None]
    hidden = h_n[None]                                   # (num_layers=1, B, H)
    return out, hidden


net_forward = jax.jit(_net_forward)


def reference_forward(x, hidden_prev, params):
    """Pure-JAX reference of the PyTorch forward, for verification."""
    B, T, I = x.shape
    H = params["w_hh"].shape[0]
    h = hidden_prev[0]
    hs = []
    for t in range(T):
        h = jnp.tanh(x[:, t, :] @ params["w_ih"].T + params["b_ih"]
                     + h @ params["w_hh"].T + params["b_hh"])
        hs.append(h)
    out_seq = jnp.stack(hs, axis=1)                      # (B, T, H)
    flat = out_seq.reshape(-1, H)
    out = flat @ params["w_lin"].T + params["b_lin"]
    return out[None], h[None]


def init_params(key):
    k1, k2, k3, k4, k5, k6 = jax.random.split(key, 6)
    H, I, O = HIDDEN_SIZE, INPUT_SIZE, OUTPUT_SIZE
    # RNN params: normal(mean=0, std=0.001), as in the PyTorch __init__.
    params = {
        "w_ih": 0.001 * jax.random.normal(k1, (H, I), jnp.float32),
        "w_hh": 0.001 * jax.random.normal(k2, (H, H), jnp.float32),
        "b_ih": 0.001 * jax.random.normal(k3, (H,), jnp.float32),
        "b_hh": 0.001 * jax.random.normal(k4, (H,), jnp.float32),
        # Linear: PyTorch default uniform(-1/sqrt(H), 1/sqrt(H)).
        "w_lin": jax.random.uniform(k5, (O, H), jnp.float32,
                                    minval=-1.0 / np.sqrt(H), maxval=1.0 / np.sqrt(H)),
        "b_lin": jax.random.uniform(k6, (O,), jnp.float32,
                                    minval=-1.0 / np.sqrt(H), maxval=1.0 / np.sqrt(H)),
    }
    return params


if __name__ == "__main__":
    key = jax.random.PRNGKey(0)
    kp, kx, kh = jax.random.split(key, 3)

    B, T = 2, 8
    params = init_params(kp)
    x = jax.random.normal(kx, (B, T, INPUT_SIZE), jnp.float32)
    hidden_prev = jax.random.normal(kh, (NUM_LAYERS, B, HIDDEN_SIZE), jnp.float32)

    out, hidden = net_forward(x, hidden_prev, params)
    out, hidden = jax.block_until_ready((out, hidden))

    ref_out, ref_hidden = reference_forward(x, hidden_prev, params)
    np.testing.assert_allclose(np.asarray(out), np.asarray(ref_out), rtol=1e-5, atol=1e-5)
    np.testing.assert_allclose(np.asarray(hidden), np.asarray(ref_hidden), rtol=1e-5, atol=1e-5)
    assert out.shape == (1, B * T, OUTPUT_SIZE)
    assert hidden.shape == (NUM_LAYERS, B, HIDDEN_SIZE)

    print("KERNEL_OK")
</pallas_src>

<mosaic_0001>
module attributes {stable_mosaic.version = 11 : i64} {
  func.func @rnn_net_kernel(%arg0: memref<16x3xf32, #tpu.memory_space<vmem>>, %arg1: memref<2x16xf32, #tpu.memory_space<vmem>>, %arg2: memref<3x16xf32, #tpu.memory_space<vmem>>, %arg3: memref<16x16xf32, #tpu.memory_space<vmem>>, %arg4: memref<1x16xf32, #tpu.memory_space<vmem>>, %arg5: memref<16x3xf32, #tpu.memory_space<vmem>>, %arg6: memref<1x3xf32, #tpu.memory_space<vmem>>, %arg7: memref<16x3xf32, #tpu.memory_space<vmem>>, %arg8: memref<2x16xf32, #tpu.memory_space<vmem>>, %arg9: memref<2x8x16xf32, #tpu.memory_space<vmem>>) attributes {dimension_semantics = [], scalar_prefetch = 0 : i64, scratch_operands = 1 : i64, tpu.core_type = #tpu.core_type<tc>} {
    %c0 = arith.constant 0 : index
    %c0_0 = arith.constant 0 : index
    %0 = vector.load %arg0[%c0, %c0_0] : memref<16x3xf32, #tpu.memory_space<vmem>>, vector<16x3xf32>
    %c0_1 = arith.constant 0 : index
    %c0_2 = arith.constant 0 : index
    %1 = vector.load %arg2[%c0_1, %c0_2] : memref<3x16xf32, #tpu.memory_space<vmem>>, vector<3x16xf32>
    %cst = arith.constant dense<0.000000e+00> : vector<16x16xf32>
    %2 = tpu.matmul %0, %1, %cst {dimension_numbers = #tpu.dot_dimension_numbers<[1], [0], [0], [1], [0, 0, 1, 1], [], []>} : vector<16x3xf32>, vector<3x16xf32>, vector<16x16xf32> -> vector<16x16xf32>
    %c0_3 = arith.constant 0 : index
    %c0_4 = arith.constant 0 : index
    %3 = vector.load %arg4[%c0_3, %c0_4] : memref<1x16xf32, #tpu.memory_space<vmem>>, vector<1x16xf32>
    %4 = vector.broadcast %3 : vector<1x16xf32> to vector<16x16xf32>
    %5 = arith.addf %2, %4 : vector<16x16xf32>
    %6 = vector.shape_cast %5 : vector<16x16xf32> to vector<2x8x16xf32>
    %c0_5 = arith.constant 0 : index
    %c0_6 = arith.constant 0 : index
    %7 = vector.load %arg3[%c0_5, %c0_6] : memref<16x16xf32, #tpu.memory_space<vmem>>, vector<16x16xf32>
    %c0_7 = arith.constant 0 : index
    %c0_8 = arith.constant 0 : index
    %8 = vector.load %arg1[%c0_7, %c0_8] : memref<2x16xf32, #tpu.memory_space<vmem>>, vector<2x16xf32>
    %9 = vector.extract_strided_slice %6 {offsets = [0, 0, 0], sizes = [2, 1, 16], strides = [1, 1, 1]} : vector<2x8x16xf32> to vector<2x1x16xf32>
    %10 = vector.shape_cast %9 : vector<2x1x16xf32> to vector<2x16xf32>
    %cst_9 = arith.constant dense<0.000000e+00> : vector<2x16xf32>
    %11 = tpu.matmul %8, %7, %cst_9 {dimension_numbers = #tpu.dot_dimension_numbers<[1], [0], [0], [1], [0, 0, 1, 1], [], []>} : vector<2x16xf32>, vector<16x16xf32>, vector<2x16xf32> -> vector<2x16xf32>
    %12 = arith.addf %10, %11 : vector<2x16xf32>
    %13 = math.tanh %12 : vector<2x16xf32>
    %14 = vector.shape_cast %13 : vector<2x16xf32> to vector<2x1x16xf32>
    %c0_10 = arith.constant 0 : index
    %c0_11 = arith.constant 0 : index
    %c0_12 = arith.constant 0 : index
    %15 = vector.load %arg9[%c0_10, %c0_11, %c0_12] : memref<2x8x16xf32, #tpu.memory_space<vmem>>, vector<2x1x16xf32>
    tpu.vector_store %arg9[%c0_10, %c0_11, %c0_12], %14 {strides = array<i32>} : memref<2x8x16xf32, #tpu.memory_space<vmem>>, vector<2x1x16xf32>,
    %16 = vector.extract_strided_slice %6 {offsets = [0, 1, 0], sizes = [2, 1, 16], strides = [1, 1, 1]} : vector<2x8x16xf32> to vector<2x1x16xf32>
    %17 = vector.shape_cast %16 : vector<2x1x16xf32> to vector<2x16xf32>
    %cst_13 = arith.constant dense<0.000000e+00> : vector<2x16xf32>
    %18 = tpu.matmul %13, %7, %cst_13 {dimension_numbers = #tpu.dot_dimension_numbers<[1], [0], [0], [1], [0, 0, 1, 1], [], []>} : vector<2x16xf32>, vector<16x16xf32>, vector<2x16xf32> -> vector<2x16xf32>
    %19 = arith.addf %17, %18 : vector<2x16xf32>
    %20 = math.tanh %19 : vector<2x16xf32>
    %21 = vector.shape_cast %20 : vector<2x16xf32> to vector<2x1x16xf32>
    %c0_14 = arith.constant 0 : index
    %c1 = arith.constant 1 : index
    %c0_15 = arith.constant 0 : index
    %22 = vector.load %arg9[%c0_14, %c1, %c0_15] : memref<2x8x16xf32, #tpu.memory_space<vmem>>, vector<2x1x16xf32>
    tpu.vector_store %arg9[%c0_14, %c1, %c0_15], %21 {strides = array<i32>} : memref<2x8x16xf32, #tpu.memory_space<vmem>>, vector<2x1x16xf32>,
    %23 = vector.extract_strided_slice %6 {offsets = [0, 2, 0], sizes = [2, 1, 16], strides = [1, 1, 1]} : vector<2x8x16xf32> to vector<2x1x16xf32>
    %24 = vector.shape_cast %23 : vector<2x1x16xf32> to vector<2x16xf32>
    %cst_16 = arith.constant dense<0.000000e+00> : vector<2x16xf32>
    %25 = tpu.matmul %20, %7, %cst_16 {dimension_numbers = #tpu.dot_dimension_numbers<[1], [0], [0], [1], [0, 0, 1, 1], [], []>} : vector<2x16xf32>, vector<16x16xf32>, vector<2x16xf32> -> vector<2x16xf32>
    %26 = arith.addf %24, %25 : vector<2x16xf32>
    %27 = math.tanh %26 : vector<2x16xf32>
    %28 = vector.shape_cast %27 : vector<2x16xf32> to vector<2x1x16xf32>
    %c0_17 = arith.constant 0 : index
    %c2 = arith.constant 2 : index
    %c0_18 = arith.constant 0 : index
    %29 = vector.load %arg9[%c0_17, %c2, %c0_18] : memref<2x8x16xf32, #tpu.memory_space<vmem>>, vector<2x1x16xf32>
    tpu.vector_store %arg9[%c0_17, %c2, %c0_18], %28 {strides = array<i32>} : memref<2x8x16xf32, #tpu.memory_space<vmem>>, vector<2x1x16xf32>,
    %30 = vector.extract_strided_slice %6 {offsets = [0, 3, 0], sizes = [2, 1, 16], strides = [1, 1, 1]} : vector<2x8x16xf32> to vector<2x1x16xf32>
    %31 = vector.shape_cast %30 : vector<2x1x16xf32> to vector<2x16xf32>
    %cst_19 = arith.constant dense<0.000000e+00> : vector<2x16xf32>
    %32 = tpu.matmul %27, %7, %cst_19 {dimension_numbers = #tpu.dot_dimension_numbers<[1], [0], [0], [1], [0, 0, 1, 1], [], []>} : vector<2x16xf32>, vector<16x16xf32>, vector<2x16xf32> -> vector<2x16xf32>
    %33 = arith.addf %31, %32 : vector<2x16xf32>
    %34 = math.tanh %33 : vector<2x16xf32>
    %35 = vector.shape_cast %34 : vector<2x16xf32> to vector<2x1x16xf32>
    %c0_20 = arith.constant 0 : index
    %c3 = arith.constant 3 : index
    %c0_21 = arith.constant 0 : index
    %36 = vector.load %arg9[%c0_20, %c3, %c0_21] : memref<2x8x16xf32, #tpu.memory_space<vmem>>, vector<2x1x16xf32>
    tpu.vector_store %arg9[%c0_20, %c3, %c0_21], %35 {strides = array<i32>} : memref<2x8x16xf32, #tpu.memory_space<vmem>>, vector<2x1x16xf32>,
    %37 = vector.extract_strided_slice %6 {offsets = [0, 4, 0], sizes = [2, 1, 16], strides = [1, 1, 1]} : vector<2x8x16xf32> to vector<2x1x16xf32>
    %38 = vector.shape_cast %37 : vector<2x1x16xf32> to vector<2x16xf32>
    %cst_22 = arith.constant dense<0.000000e+00> : vector<2x16xf32>
    %39 = tpu.matmul %34, %7, %cst_22 {dimension_numbers = #tpu.dot_dimension_numbers<[1], [0], [0], [1], [0, 0, 1, 1], [], []>} : vector<2x16xf32>, vector<16x16xf32>, vector<2x16xf32> -> vector<2x16xf32>
    %40 = arith.addf %38, %39 : vector<2x16xf32>
    %41 = math.tanh %40 : vector<2x16xf32>
    %42 = vector.shape_cast %41 : vector<2x16xf32> to vector<2x1x16xf32>
    %c0_23 = arith.constant 0 : index
    %c4 = arith.constant 4 : index
    %c0_24 = arith.constant 0 : index
    %43 = vector.load %arg9[%c0_23, %c4, %c0_24] : memref<2x8x16xf32, #tpu.memory_space<vmem>>, vector<2x1x16xf32>
    tpu.vector_store %arg9[%c0_23, %c4, %c0_24], %42 {strides = array<i32>} : memref<2x8x16xf32, #tpu.memory_space<vmem>>, vector<2x1x16xf32>,
    %44 = vector.extract_strided_slice %6 {offsets = [0, 5, 0], sizes = [2, 1, 16], strides = [1, 1, 1]} : vector<2x8x16xf32> to vector<2x1x16xf32>
    %45 = vector.shape_cast %44 : vector<2x1x16xf32> to vector<2x16xf32>
    %cst_25 = arith.constant dense<0.000000e+00> : vector<2x16xf32>
    %46 = tpu.matmul %41, %7, %cst_25 {dimension_numbers = #tpu.dot_dimension_numbers<[1], [0], [0], [1], [0, 0, 1, 1], [], []>} : vector<2x16xf32>, vector<16x16xf32>, vector<2x16xf32> -> vector<2x16xf32>
    %47 = arith.addf %45, %46 : vector<2x16xf32>
    %48 = math.tanh %47 : vector<2x16xf32>
    %49 = vector.shape_cast %48 : vector<2x16xf32> to vector<2x1x16xf32>
    %c0_26 = arith.constant 0 : index
    %c5 = arith.constant 5 : index
    %c0_27 = arith.constant 0 : index
    %50 = vector.load %arg9[%c0_26, %c5, %c0_27] : memref<2x8x16xf32, #tpu.memory_space<vmem>>, vector<2x1x16xf32>
    tpu.vector_store %arg9[%c0_26, %c5, %c0_27], %49 {strides = array<i32>} : memref<2x8x16xf32, #tpu.memory_space<vmem>>, vector<2x1x16xf32>,
    %51 = vector.extract_strided_slice %6 {offsets = [0, 6, 0], sizes = [2, 1, 16], strides = [1, 1, 1]} : vector<2x8x16xf32> to vector<2x1x16xf32>
    %52 = vector.shape_cast %51 : vector<2x1x16xf32> to vector<2x16xf32>
    %cst_28 = arith.constant dense<0.000000e+00> : vector<2x16xf32>
    %53 = tpu.matmul %48, %7, %cst_28 {dimension_numbers = #tpu.dot_dimension_numbers<[1], [0], [0], [1], [0, 0, 1, 1], [], []>} : vector<2x16xf32>, vector<16x16xf32>, vector<2x16xf32> -> vector<2x16xf32>
    %54 = arith.addf %52, %53 : vector<2x16xf32>
    %55 = math.tanh %54 : vector<2x16xf32>
    %56 = vector.shape_cast %55 : vector<2x16xf32> to vector<2x1x16xf32>
    %c0_29 = arith.constant 0 : index
    %c6 = arith.constant 6 : index
    %c0_30 = arith.constant 0 : index
    %57 = vector.load %arg9[%c0_29, %c6, %c0_30] : memref<2x8x16xf32, #tpu.memory_space<vmem>>, vector<2x1x16xf32>
    tpu.vector_store %arg9[%c0_29, %c6, %c0_30], %56 {strides = array<i32>} : memref<2x8x16xf32, #tpu.memory_space<vmem>>, vector<2x1x16xf32>,
    %58 = vector.extract_strided_slice %6 {offsets = [0, 7, 0], sizes = [2, 1, 16], strides = [1, 1, 1]} : vector<2x8x16xf32> to vector<2x1x16xf32>
    %59 = vector.shape_cast %58 : vector<2x1x16xf32> to vector<2x16xf32>
    %cst_31 = arith.constant dense<0.000000e+00> : vector<2x16xf32>
    %60 = tpu.matmul %55, %7, %cst_31 {dimension_numbers = #tpu.dot_dimension_numbers<[1], [0], [0], [1], [0, 0, 1, 1], [], []>} : vector<2x16xf32>, vector<16x16xf32>, vector<2x16xf32> -> vector<2x16xf32>
    %61 = arith.addf %59, %60 : vector<2x16xf32>
    %62 = math.tanh %61 : vector<2x16xf32>
    %63 = vector.shape_cast %62 : vector<2x16xf32> to vector<2x1x16xf32>
    %c0_32 = arith.constant 0 : index
    %c7 = arith.constant 7 : index
    %c0_33 = arith.constant 0 : index
    %64 = vector.load %arg9[%c0_32, %c7, %c0_33] : memref<2x8x16xf32, #tpu.memory_space<vmem>>, vector<2x1x16xf32>
    tpu.vector_store %arg9[%c0_32, %c7, %c0_33], %63 {strides = array<i32>} : memref<2x8x16xf32, #tpu.memory_space<vmem>>, vector<2x1x16xf32>,
    %c0_34 = arith.constant 0 : index
    %c0_35 = arith.constant 0 : index
    %c0_36 = arith.constant 0 : index
    %65 = vector.load %arg9[%c0_34, %c0_35, %c0_36] : memref<2x8x16xf32, #tpu.memory_space<vmem>>, vector<2x8x16xf32>
    %66 = vector.shape_cast %65 : vector<2x8x16xf32> to vector<16x16xf32>
    %c0_37 = arith.constant 0 : index
    %c0_38 = arith.constant 0 : index
    %67 = vector.load %arg5[%c0_37, %c0_38] : memref<16x3xf32, #tpu.memory_space<vmem>>, vector<16x3xf32>
    %cst_39 = arith.constant dense<0.000000e+00> : vector<16x3xf32>
    %68 = tpu.matmul %66, %67, %cst_39 {dimension_numbers = #tpu.dot_dimension_numbers<[1], [0], [0], [1], [0, 0, 1, 1], [], []>} : vector<16x16xf32>, vector<16x3xf32>, vector<16x3xf32> -> vector<16x3xf32>
    %c0_40 = arith.constant 0 : index
    %c0_41 = arith.constant 0 : index
    %69 = vector.load %arg6[%c0_40, %c0_41] : memref<1x3xf32, #tpu.memory_space<vmem>>, vector<1x3xf32>
    %70 = vector.broadcast %69 : vector<1x3xf32> to vector<16x3xf32>
    %71 = arith.addf %68, %70 : vector<16x3xf32>
    %c0_42 = arith.constant 0 : index
    %c0_43 = arith.constant 0 : index
    %72 = vector.load %arg7[%c0_42, %c0_43] : memref<16x3xf32, #tpu.memory_space<vmem>>, vector<16x3xf32>
    tpu.vector_store %arg7[%c0_42, %c0_43], %71 {strides = array<i32>} : memref<16x3xf32, #tpu.memory_space<vmem>>, vector<16x3xf32>,
    %c0_44 = arith.constant 0 : index
    %c0_45 = arith.constant 0 : index
    %73 = vector.load %arg8[%c0_44, %c0_45] : memref<2x16xf32, #tpu.memory_space<vmem>>, vector<2x16xf32>
    tpu.vector_store %arg8[%c0_44, %c0_45], %62 {strides = array<i32>} : memref<2x16xf32, #tpu.memory_space<vmem>>, vector<2x16xf32>,
    return
  }
}

</mosaic_0001>

<bundles_post_ra>
// kernel: _net_forward.1
= control target key start
LH: loop header
LB: loop body
LE: loop exit
PB: predicated region body
PF: predicated region fallthrough
CT: control target
= control target key end

     0   :  { %vm46_vm0 = vcmask 1042432   ;;  %vm39_vm1 = vcmask 23552   ;;  %v1155_v5 = vmov 0.0|0.0   ;;  %s1330_s0 = inlined_call_operand.vmem [shape: f32[16,3], index: 0, kind: input, shape index: {}]   ;;  %s1331_s1 = inlined_call_operand.vmem [shape: f32[2,16], index: 1, kind: input, shape index: {}]   ;;  %s1332_s2 = inlined_call_operand.vmem [shape: f32[3,16], index: 2, kind: input, shape index: {}]   ;;  %s1333_s3 = inlined_call_operand.vmem [shape: f32[16,16], index: 3, kind: input, shape index: {}]   ;;  %s1334_s4 = inlined_call_operand.vmem [shape: f32[1,16], index: 4, kind: input, shape index: {}]   ;;  %s1335_s5 = inlined_call_operand.vmem [shape: f32[16,3], index: 5, kind: input, shape index: {}]   ;;  %s1336_s6 = inlined_call_operand.vmem [shape: f32[1,3], index: 6, kind: input, shape index: {}]   ;;  %s1337_s7 = inlined_call_operand.vmem [shape: f32[16,3], index: 7, kind: output, shape index: {0}]   ;;  %s1338_s8 = inlined_call_operand.hbm [shape: f32[2,16], index: 8, kind: output, shape index: {1}]  }
   0x1   :  { %v31_v0 = vld [vmem:[%s1332_s2] sm:$0x7]  ;;  %v30_v2 = vld [vmem:[%s1330_s0 + $0x8] sm:$0xff]  ;;  %1067 = vmatprep.subr.bf16.mxu1 %v1155_v5 }
   0x2   :  { %v29_v1 = vld [vmem:[%s1330_s0] sm:$0xff]  ;;  %999 = vmatprep.subr.msk.mxu0 %vm46_vm0, %v31_v0  ;;  %v126_v4 = vld [vmem:[%s1333_s3 + $0x8] sm:$0xff] }
   0x3   :  { %1001 = vmatprep.mubr.msk.f32.mxu0 %vm39_vm1, %v29_v1  ;;  %v125_v3 = vld [vmem:[%s1333_s3] sm:$0xff]  ;;  %1000 = vmatpush3.msk.msra.mxu0 %vm46_vm0, %v31_v0 }
   0x4   :  { %v1221_v6 = vpack.c.bf16 %v126_v4, %v125_v3 }
   0x5   :  { %14 = vsyncpa [#allocation4], 0  ;;  %1002 = vmatmul.mubr.msk.f32.vlgmr.msra.gmra.mrb[0].mxu0 %vm39_vm1, %v30_v2  ;;  %vm1156_vm2 = vmmov 0   ;;  %v1157_v7 = vmov 0.0   ;;  %v127_v8 = vld [vmem:[%s1331_s1] sm:$0x3]  ;;  %1070 = vmatprep.subr.bf16.mxu0 %v1155_v5 }
   0x6   :  { %1008 = vmatprep.mubr.msk.f32.mxu1 %vm1156_vm2, %v1157_v7  ;;  %1069 = vmatpush3.bf16.msra.mxu1 %v1221_v6  ;;  %vm128_vm3 = vcmask 130048   ;;  %v953_v9 = vld [vmem:[%s1334_s4] ss:$0 sm:$0xff]  ;;  %vm210_vm4 = vcmask 122880   ;;  %vm216_vm5 = vcmask 1041409   ;;  %vm298_vm6 = vcmask 123905  }
   0x7   :  { %1072 = vmatpush3.bf16.msra.mxu0 %v1221_v6  ;;  %1015 = vmatprep.mubr.msk.f32.mxu0 %vm1156_vm2, %v1157_v7  ;;  %vm386_vm7 = vcmask 124930   ;;  %vm475_vm8 = vcmask 125955   ;;  %vm564_vm9 = vcmask 126980   ;;  %vm653_vm10 = vcmask 128005  }
   0x8   :  { %1073 = vmatprep.subr.bf16.mxu1 %v1155_v5  ;;  %1076 = vmatprep.subr.bf16.mxu0 %v1155_v5  ;;  %vm742_vm11 = vcmask 129030   ;;  %vm831_vm12 = vcmask 130055  }
   0x9   :  { %1009 = vmatmul.mubr.msk.f32.vlgmr.msra.gmra.mrb[0].mxu1 %vm128_vm3, %v127_v8 }
   0xa   :  { %1075 = vmatpush3.bf16.msra.mxu1 %v1221_v6  ;;  %1022 = vmatprep.mubr.msk.f32.mxu1 %vm1156_vm2, %v1157_v7 }
   0xb   :  { %1079 = vmatprep.subr.bf16.mxu1 %v1155_v5 }
  0xd8   :  { %v1003_v10 = vpop.f32.mrb[0].mxu0 }
  0xd9   :  { %v116_v11 = vpop.f32.mrb[1].mxu0  ;;  %v1246_v13 = vadd.f32 %v1003_v10, %v953_v9 }
  0xda   :  { %v1244_v12 = vadd.f32 %v953_v9, %v116_v11 }
  0xdc   :  { %v198_v14 = vpop.f32.mrb[0].mxu1 }
  0xdd   :  { %v203_v15 = vrot.slane %v198_v14, 1  ;;  %v206_v16 = vadd.f32 %v198_v14, %v1244_v12  ;;  %v1010_v17 = vpop.f32.mrb[1].mxu1 }
  0xdf   :  { %v207_v18 = vadd.f32 %v203_v15, %v1246_v13  ;;  %1099 = vtanh.f32 %v206_v16 }
  0xe1   :  { %1101 = vtanh.f32 %v207_v18 }
  0xe9   :  { %v1100_v19 = vpop.eup %1099 }
  0xea   :  { %211 = vst.msk [vmem:[#allocation2] sm:$0x1] %vm210_vm4, %v1100_v19 }
  0xeb   :  { %v1102_v20 = vpop.eup %1101 }
  0xec   :  { %212 = vst.msk [vmem:[#allocation2 + $0x8] sm:$0x1] %vm210_vm4, %v1102_v20  ;;  %v215_v21 = vrot.slane %v1102_v20, 7 }
  0xee   :  { %v217_v22 = vsel %vm216_vm5, %v215_v21, %v1100_v19 }
  0xef   :  { %1016 = vmatmul.mubr.msk.f32.vlgmr.msra.gmra.mrb[2].mxu0 %vm128_vm3, %v217_v22 }
  0xf0   :  { %1078 = vmatpush3.bf16.msra.mxu0 %v1221_v6  ;;  %1029 = vmatprep.mubr.msk.f32.mxu0 %vm1156_vm2, %v1157_v7 }
  0xf1   :  { %1082 = vmatprep.subr.bf16.mxu0 %v1155_v5 }
 0x1c2   :  { %v286_v23 = vpop.f32.mrb[2].mxu0 }
 0x1c3   :  { %v291_v24 = vrot.slane %v286_v23, 7  ;;  %v295_v25 = vadd.f32 %v286_v23, %v1246_v13  ;;  %v1017_v26 = vpop.f32.mrb[3].mxu0 }
 0x1c4   :  { %v837_v26 = vld [vmem:[%s1335_s5 + $0x8] sm:$0xff] }
 0x1c5   :  { %v294_v27 = vadd.f32 %v291_v24, %v1244_v12  ;;  %1103 = vtanh.f32 %v295_v25  ;;  %v836_v25 = vld [vmem:[%s1335_s5] sm:$0xff]  ;;  %s1158_s5 = smov [#allocation3]  }
 0x1c6   :  { %s943_s18 = sshll.u32 %s1158_s5, 4  ;;  %s944_s18 = int_to_ptr.vmem [resolvable:$true] %s943_s18 }
 0x1c7   :  { %1105 = vtanh.f32 %v294_v27  ;;  %v1091_v27 = vpack.c.bf16 %v837_v26, %v836_v25  ;;  %s1131_s19 = scalar_lea.vmem %s944_s18, 32  ;;  %p1136_p1 = scmp.lt.s32.totalorder %s944_s18, %s944_s18 }
 0x1c8   :  { %p1132_p0 = scmp.ne.s32.totalorder %s944_s18, %s1131_s19  ;;  %p1137_p2 = scmp.lt.s32.totalorder %s1131_s19, %s1131_s19 }
 0x1ca   :  { %p1138_p3 = por %p1137_p2, %p1136_p1 }
 0x1cc   :  { %p1139_p4 = pnand %p1138_p3, %p1132_p0 }
 0x1cf   :  { %v1104_v28 = vpop.eup %1103 }
 0x1d0   :  { %300 = vst.msk [vmem:[#allocation2 + $0x8] sm:$0x2] %vm298_vm6, %v1104_v28 }
 0x1d1   :  { %v1106_v29 = vpop.eup %1105 }
 0x1d2   :  { %299 = vst.msk [vmem:[#allocation2] sm:$0x2] %vm298_vm6, %v1106_v29  ;;  %v303_v30 = vrot.slane %v1106_v29, 1 }
 0x1d4   :  { %v304_v31 = vsel %vm216_vm5, %v1104_v28, %v303_v30 }
 0x1d5   :  { %1023 = vmatmul.mubr.msk.f32.vlgmr.msra.gmra.mrb[2].mxu1 %vm128_vm3, %v304_v31 }
 0x1d6   :  { %1081 = vmatpush3.bf16.msra.mxu1 %v1221_v6  ;;  %1036 = vmatprep.mubr.msk.f32.mxu1 %vm1156_vm2, %v1157_v7 }
 0x1d7   :  { %1085 = vmatprep.subr.bf16.mxu1 %v1155_v5 }
 0x2a8   :  { %v373_v32 = vpop.f32.mrb[2].mxu1 }
 0x2a9   :  { %v378_v33 = vrot.slane %v373_v32, 6  ;;  %v379_v34 = vrot.slane %v373_v32, 7  ;;  %v1024_v35 = vpop.f32.mrb[3].mxu1 }
 0x2ab   :  { %v382_v36 = vadd.f32 %v378_v33, %v1244_v12  ;;  %v383_v37 = vadd.f32 %v379_v34, %v1246_v13 }
 0x2ad   :  { %1107 = vtanh.f32 %v382_v36 }
 0x2ae   :  { %1109 = vtanh.f32 %v383_v37 }
 0x2b7   :  { %v1108_v38 = vpop.eup %1107 }
 0x2b8   :  { %v1110_v39 = vpop.eup %1109  ;;  %387 = vst.msk [vmem:[#allocation2] sm:$0x4] %vm386_vm7, %v1108_v38  ;;  %v391_v40 = vrot.slane %v1108_v38, 2 }
 0x2b9   :  { %388 = vst.msk [vmem:[#allocation2 + $0x8] sm:$0x4] %vm386_vm7, %v1110_v39  ;;  %v392_v41 = vrot.slane %v1110_v39, 1 }
 0x2bb   :  { %v393_v42 = vsel %vm216_vm5, %v392_v41, %v391_v40 }
 0x2bc   :  { %1030 = vmatmul.mubr.msk.f32.vlgmr.msra.gmra.mrb[4].mxu0 %vm128_vm3, %v393_v42 }
 0x2bd   :  { %1084 = vmatpush3.bf16.msra.mxu0 %v1221_v6  ;;  %1043 = vmatprep.mubr.msk.f32.mxu0 %vm1156_vm2, %v1157_v7 }
 0x2be   :  { %1088 = vmatprep.subr.bf16.mxu0 %v1155_v5 }
 0x38f   :  { %v462_v43 = vpop.f32.mrb[4].mxu0 }
 0x390   :  { %v467_v44 = vrot.slane %v462_v43, 5  ;;  %v468_v45 = vrot.slane %v462_v43, 6  ;;  %v1031_v46 = vpop.f32.mrb[5].mxu0 }
 0x392   :  { %v471_v47 = vadd.f32 %v467_v44, %v1244_v12  ;;  %v472_v48 = vadd.f32 %v468_v45, %v1246_v13 }
 0x394   :  { %1111 = vtanh.f32 %v471_v47 }
 0x395   :  { %1113 = vtanh.f32 %v472_v48 }
 0x39e   :  { %v1112_v49 = vpop.eup %1111 }
 0x39f   :  { %v1114_v50 = vpop.eup %1113  ;;  %476 = vst.msk [vmem:[#allocation2] sm:$0x8] %vm475_vm8, %v1112_v49  ;;  %v480_v51 = vrot.slane %v1112_v49, 3 }
 0x3a0   :  { %477 = vst.msk [vmem:[#allocation2 + $0x8] sm:$0x8] %vm475_vm8, %v1114_v50  ;;  %v481_v52 = vrot.slane %v1114_v50, 2 }
 0x3a2   :  { %v482_v53 = vsel %vm216_vm5, %v481_v52, %v480_v51 }
 0x3a3   :  { %1037 = vmatmul.mubr.msk.f32.vlgmr.msra.gmra.mrb[4].mxu1 %vm128_vm3, %v482_v53 }
 0x3a4   :  { %1087 = vmatpush3.bf16.msra.mxu1 %v1221_v6  ;;  %1050 = vmatprep.mubr.msk.f32.mxu1 %vm1156_vm2, %v1157_v7 }
 0x3a5   :  { %1092 = vmatprep.subr.bf16.mxu1 %v1091_v27 }
 0x476   :  { %v551_v54 = vpop.f32.mrb[4].mxu1 }
 0x477   :  { %v556_v55 = vrot.slane %v551_v54, 4  ;;  %v557_v56 = vrot.slane %v551_v54, 5  ;;  %v1038_v57 = vpop.f32.mrb[5].mxu1 }
 0x479   :  { %v560_v58 = vadd.f32 %v556_v55, %v1244_v12  ;;  %v561_v59 = vadd.f32 %v557_v56, %v1246_v13 }
 0x47b   :  { %1115 = vtanh.f32 %v560_v58 }
 0x47c   :  { %1117 = vtanh.f32 %v561_v59 }
 0x485   :  { %v1116_v60 = vpop.eup %1115 }
 0x486   :  { %v1118_v61 = vpop.eup %1117  ;;  %565 = vst.msk [vmem:[#allocation2] sm:$0x10] %vm564_vm9, %v1116_v60  ;;  %v569_v62 = vrot.slane %v1116_v60, 4 }
 0x487   :  { %566 = vst.msk [vmem:[#allocation2 + $0x8] sm:$0x10] %vm564_vm9, %v1118_v61  ;;  %v570_v63 = vrot.slane %v1118_v61, 3 }
 0x489   :  { %v571_v0 = vsel %vm216_vm5, %v570_v63, %v569_v62 }
 0x48a   :  { %1044 = vmatmul.mubr.msk.f32.vlgmr.msra.gmra.mrb[6].mxu0 %vm128_vm3, %v571_v0 }
 0x48b   :  { %1090 = vmatpush3.bf16.msra.mxu0 %v1221_v6  ;;  %1057 = vmatprep.mubr.msk.f32.mxu0 %vm1156_vm2, %v1157_v7 }
 0x55d   :  { %v640_v1 = vpop.f32.mrb[6].mxu0 }
 0x55e   :  { %v645_v2 = vrot.slane %v640_v1, 3  ;;  %v646_v3 = vrot.slane %v640_v1, 4  ;;  %v1045_v4 = vpop.f32.mrb[7].mxu0 }
 0x560   :  { %v649_v5 = vadd.f32 %v645_v2, %v1244_v12  ;;  %v650_v8 = vadd.f32 %v646_v3, %v1246_v13 }
 0x562   :  { %1119 = vtanh.f32 %v649_v5 }
 0x563   :  { %1121 = vtanh.f32 %v650_v8 }
 0x56c   :  { %v1120_v9 = vpop.eup %1119 }
 0x56d   :  { %v1122_v10 = vpop.eup %1121  ;;  %654 = vst.msk [vmem:[#allocation2] sm:$0x20] %vm653_vm10, %v1120_v9  ;;  %v658_v11 = vrot.slane %v1120_v9, 5 }
 0x56e   :  { %655 = vst.msk [vmem:[#allocation2 + $0x8] sm:$0x20] %vm653_vm10, %v1122_v10  ;;  %v659_v6 = vrot.slane %v1122_v10, 4 }
 0x570   :  { %v660_v14 = vsel %vm216_vm5, %v659_v6, %v658_v11 }
 0x571   :  { %1051 = vmatmul.mubr.msk.f32.vlgmr.msra.gmra.mrb[6].mxu1 %vm128_vm3, %v660_v14 }
 0x572   :  { %1094 = vmatpush3.bf16.msra.mxu1 %v1091_v27 }
 0x644   :  { %v729_v7 = vpop.f32.mrb[6].mxu1 }
 0x645   :  { %v734_v15 = vrot.slane %v729_v7, 2  ;;  %v735_v16 = vrot.slane %v729_v7, 3  ;;  %v1052_v17 = vpop.f32.mrb[7].mxu1 }
 0x647   :  { %v738_v18 = vadd.f32 %v734_v15, %v1244_v12  ;;  %v739_v19 = vadd.f32 %v735_v16, %v1246_v13 }
 0x649   :  { %1123 = vtanh.f32 %v738_v18 }
 0x64a   :  { %1125 = vtanh.f32 %v739_v19 }
 0x653   :  { %v1124_v20 = vpop.eup %1123 }
 0x654   :  { %v1126_v21 = vpop.eup %1125  ;;  %743 = vst.msk [vmem:[#allocation2] sm:$0x40] %vm742_vm11, %v1124_v20  ;;  %v747_v22 = vrot.slane %v1124_v20, 6 }
 0x655   :  { %744 = vst.msk [vmem:[#allocation2 + $0x8] sm:$0x40] %vm742_vm11, %v1126_v21  ;;  %v748_v23 = vrot.slane %v1126_v21, 5 }
 0x657   :  { %v749_v24 = vsel %vm216_vm5, %v748_v23, %v747_v22 }
 0x658   :  { %1058 = vmatmul.mubr.msk.f32.vlgmr.msra.gmra.mrb[8].mxu0 %vm128_vm3, %v749_v24 }
 0x72b   :  { %v818_v28 = vpop.f32.mrb[8].mxu0 }
 0x72c   :  { %v823_v29 = vrot.slane %v818_v28, 1  ;;  %v824_v30 = vrot.slane %v818_v28, 2  ;;  %v1059_v31 = vpop.f32.mrb[9].mxu0 }
 0x72e   :  { %v827_v32 = vadd.f32 %v823_v29, %v1244_v12  ;;  %v828_v33 = vadd.f32 %v824_v30, %v1246_v13 }
 0x730   :  { %1127 = vtanh.f32 %v827_v32 }
 0x731   :  { %1129 = vtanh.f32 %v828_v33 }
 0x73a   :  { %v1128_v34 = vpop.eup %1127 }
 0x73b   :  { %v1130_v35 = vpop.eup %1129  ;;  %832 = vst.msk [vmem:[#allocation2] sm:$0x80] %vm831_vm12, %v1128_v34  ;;  %933 = vst.msk [vmem:[#allocation3 - $0x7] sm:$0x80] %vm831_vm12, %v1128_v34 }
 0x73c   :  { %833 = vst.msk [vmem:[#allocation2 + $0x8] sm:$0x80] %vm831_vm12, %v1130_v35  ;;  %v930_v36 = vrot.slane %v1130_v35, 7 }
 0x73e   :  { %934 = vst.msk [vmem:[#allocation3 + $0x1] sm:$0x1] %vm210_vm4, %v930_v36 }
 0x742   :  { %v834_v37 = vld [vmem:[#allocation2] sm:$0xff] }
 0x743   :  { %1064 = vmatprep.mubr.msk.f32.mxu1 %vm128_vm3, %v834_v37  ;;  %v835_v38 = vld [vmem:[#allocation2 + $0x8] sm:$0xff] }
 0x744   :  { %1065 = vmatmul.mubr.msk.f32.vlgmr.msra.gmra.mrb[8].mxu1 %vm128_vm3, %v835_v38 }
 0x745   :  { %1142 = shalt.err (!%p1139_p4)
}
 0x746   :  { %s1143_s22 = scalar_lea.hbm %s1338_s8, 32 }
 0x747   :  { %p1144_p5 = scmp.ne.s32.totalorder %s1338_s8, %s1143_s22  ;;  %p1147_p6 = scmp.lt.u32.totalorder %s1143_s22, %s1338_s8 }
 0x749   :  { %p1149_p7 = pnand %p1147_p6, %p1144_p5 }
 0x74b   :  { %1152 = shalt.err (!%p1149_p7)
}
 0x74c   :  { %946 = dma.vmem_to_hbm [thread:$0]  %s944_s18, 32, %s1338_s8, [#allocation4]   ;;  %v965_v12 = vld [vmem:[%s1336_s6] ss:$0 sm:$0xff] }
 0x817   :  { %v1066_v13 = vpop.f32.mrb[8].mxu1 }
 0x818   :  { %v923_v39 = vadd.f32 %v1066_v13, %v965_v12  ;;  %v917_v40 = vpop.f32.mrb[9].mxu1 }
 0x819   :  { %v918_v41 = vadd.f32 %v965_v12, %v917_v40 }
 0x81a   :  { %927 = vst.msk [vmem:[%s1337_s7 + $0x8] sm:$0xff] %vm39_vm1, %v923_v39 }
 0x81b   :  { %926 = vst.msk [vmem:[%s1337_s7] sm:$0xff] %vm39_vm1, %v918_v41 }
 0x81c   :  { %1153 = dma.done.wait [#allocation4], 32  }
 0x81d   :  { %1154 = vsyncadd [#allocation4], 4294967264 }
 0x81e   :  { %952 = vsyncpa [#allocation4], 1 }

</bundles_post_ra>
